<compile_context>
chip_gen: v5e
topology: v5e:2x2
jax: 0.10.0
libtpu: 0.0.40
codegen_flags: <defaults>
</compile_context>

<pallas_src>
import functools

import numpy as np
import jax
import jax.numpy as jnp
from jax.experimental import pallas as pl
from jax.experimental.pallas import tpu as pltpu


# ----------------------------------------------------------------------------
# Tiling helpers
# ----------------------------------------------------------------------------
def _tile(dim, cap, mult):
    """Largest divisor of `dim` <= cap that is a multiple of `mult`
    (full dim if it already fits; full dim is always a legal block)."""
    if dim <= cap:
        return dim
    best = None
    t = mult
    while t <= cap:
        if dim % t == 0:
            best = t
        t += mult
    if best is not None:
        return best
    # TODO(synk): fall back to a cdiv grid with a masked last step for channel
    # counts that have no multiple-of-128 divisor.
    return dim


def _pick_rows(H, W, cap=512):
    """Rows per 3x3-conv grid step so the GEMM M-tile (rows*W) is ~cap."""
    best = 1
    for t in range(1, H + 1):
        if H % t == 0 and t * W <= cap:
            best = t
    return best


# ----------------------------------------------------------------------------
# Generic fused matmul + bias (+ ReLU) kernel: Y = relu?(X @ W + b)
# grid = (M tiles, N tiles, K tiles); bf16 operands, f32 accumulation.
# ----------------------------------------------------------------------------
def _matmul_bias_kernel(x_ref, w_ref, b_ref, o_ref, acc_ref, *, relu):
    k = pl.program_id(2)

    @pl.when(k == 0)
    def _():
        acc_ref[...] = jnp.zeros_like(acc_ref)

    acc_ref[...] += jnp.dot(
        x_ref[...], w_ref[...], preferred_element_type=jnp.float32
    )

    @pl.when(k == pl.num_programs(2) - 1)
    def _():
        y = acc_ref[...] + b_ref[...]
        if relu:
            y = jnp.maximum(y, 0.0)
        o_ref[...] = y.astype(o_ref.dtype)


def pallas_matmul_bias(x, w, b, *, relu=False, out_dtype=jnp.float32):
    """x: [M, K] bf16, w: [K, N] bf16, b: [N] f32 -> [M, N] out_dtype."""
    M, K = x.shape
    K2, N = w.shape
    assert K == K2, (K, K2)
    tm = _tile(M, 512, 8)
    tn = _tile(N, 512, 128)
    tk = _tile(K, 512, 128)
    grid = (M // tm, N // tn, K // tk)
    kernel = functools.partial(_matmul_bias_kernel, relu=relu)
    return pl.pallas_call(
        kernel,
        out_shape=jax.ShapeDtypeStruct((M, N), out_dtype),
        grid_spec=pltpu.PrefetchScalarGridSpec(
            num_scalar_prefetch=0,
            grid=grid,
            in_specs=[
                pl.BlockSpec((tm, tk), lambda m, n, k: (m, k)),
                pl.BlockSpec((tk, tn), lambda m, n, k: (k, n)),
                pl.BlockSpec((1, tn), lambda m, n, k: (0, n)),
            ],
            out_specs=pl.BlockSpec((tm, tn), lambda m, n, k: (m, n)),
            scratch_shapes=[pltpu.VMEM((tm, tn), jnp.float32)],
        ),
        compiler_params=pltpu.CompilerParams(
            dimension_semantics=("parallel", "parallel", "arbitrary")
        ),
    )(x, w, b.reshape(1, N))


# ----------------------------------------------------------------------------
# Direct (im2col-free) 3x3 same-padding conv kernel.
# The zero-padded input is passed TH+2 times (same HBM buffer, no copies) with
# single-row blocks and row-offset index maps; the 9 taps are accumulated
# in-kernel while the channel dimension is tiled along the (innermost) K axis.
# ----------------------------------------------------------------------------
def _conv3x3_kernel(*refs, TH, W, relu):
    nx = TH + 2
    x_refs = refs[:nx]
    w_ref, b_ref, o_ref, acc_ref = refs[nx:nx + 4]
    k = pl.program_id(3)

    @pl.when(k == 0)
    def _():
        acc_ref[...] = jnp.zeros_like(acc_ref)

    # Padded input rows covering output rows [g*TH, g*TH + TH).  Cast to f32 so
    # the shifted (unaligned) sublane slices below stay on the simple f32 path.
    rows = [x_refs[j][0, 0].astype(jnp.float32) for j in range(nx)]  # [W+2, tk]

    contrib = None
    for dh in range(3):
        for dw in range(3):
            if TH == 1:
                lhs = rows[dh][dw:dw + W, :]
            else:
                lhs = jnp.concatenate(
                    [rows[r + dh][dw:dw + W, :] for r in range(TH)], axis=0
                )
            d = jnp.dot(lhs.astype(jnp.bfloat16), w_ref[dh, dw],
                        preferred_element_type=jnp.float32)
            contrib = d if contrib is None else contrib + d
    acc_ref[...] += contrib

    @pl.when(k == pl.num_programs(3) - 1)
    def _():
        bias = b_ref[...]
        for r in range(TH):
            y = acc_ref[r * W:(r + 1) * W, :] + bias
            if relu:
                y = jnp.maximum(y, 0.0)
            o_ref[0, r] = y.astype(o_ref.dtype)


def conv3x3_same(x, w, b, *, relu):
    """3x3 conv, stride 1, zero padding 1, NHWC.  w: [3, 3, Cin, Cout] bf16."""
    B, H, W, C = x.shape
    Cout = w.shape[-1]
    xp = jnp.pad(x, ((0, 0), (1, 1), (1, 1), (0, 0)))          # zero padding
    TH = _pick_rows(H, W)                                      # rows / grid step
    nx = TH + 2
    tk = _tile(C, 512, 128)
    tn = _tile(Cout, 512, 128)

    x_specs = [
        pl.BlockSpec((1, 1, W + 2, tk),
                     lambda b_, g, n, k, j=j: (b_, g * TH + j, 0, k))
        for j in range(nx)
    ]
    kernel = functools.partial(_conv3x3_kernel, TH=TH, W=W, relu=relu)
    return pl.pallas_call(
        kernel,
        out_shape=jax.ShapeDtypeStruct((B, H, W, Cout), jnp.bfloat16),
        grid_spec=pltpu.PrefetchScalarGridSpec(
            num_scalar_prefetch=0,
            grid=(B, H // TH, Cout // tn, C // tk),
            in_specs=x_specs + [
                pl.BlockSpec((3, 3, tk, tn), lambda b_, g, n, k: (0, 0, k, n)),
                pl.BlockSpec((1, tn), lambda b_, g, n, k: (0, n)),
            ],
            out_specs=pl.BlockSpec((1, TH, W, tn),
                                   lambda b_, g, n, k: (b_, g, 0, n)),
            scratch_shapes=[pltpu.VMEM((TH * W, tn), jnp.float32)],
        ),
        compiler_params=pltpu.CompilerParams(
            dimension_semantics=("parallel", "parallel", "parallel", "arbitrary")
        ),
    )(*([xp] * nx), w, b.reshape(1, Cout))


# ----------------------------------------------------------------------------
# 2x bilinear upsample (align_corners=False) as a pure-VPU 2-tap blend kernel.
# Each grid step reads 3 (edge-clamped) input rows and writes 2 output rows;
# even/odd output columns are packed side-by-side on the lane axis and
# interleaved afterwards with free contiguous reshapes.
# ----------------------------------------------------------------------------
def _upsample2x_kernel(x0_ref, x1_ref, x2_ref, o_ref):
    prev = x0_ref[0, 0].astype(jnp.float32)   # row i-1 (edge clamped)
    cur = x1_ref[0, 0].astype(jnp.float32)    # row i
    nxt = x2_ref[0, 0].astype(jnp.float32)    # row i+1 (edge clamped)
    even_h = 0.25 * prev + 0.75 * cur         # output row 2i
    odd_h = 0.75 * cur + 0.25 * nxt           # output row 2i + 1

    def wblend(row):                          # [W, C] -> [W, 2C]
        left = jnp.concatenate([row[:1], row[:-1]], axis=0)
        right = jnp.concatenate([row[1:], row[-1:]], axis=0)
        even_w = 0.25 * left + 0.75 * row     # output col 2j
        odd_w = 0.75 * row + 0.25 * right     # output col 2j + 1
        return jnp.concatenate([even_w, odd_w], axis=-1)

    o_ref[0, 0] = wblend(even_h).astype(o_ref.dtype)
    o_ref[0, 1] = wblend(odd_h).astype(o_ref.dtype)


def upsample2x_bilinear(x):
    """nn.Upsample(scale_factor=2, mode='bilinear', align_corners=False), NHWC."""
    B, H, W, C = x.shape
    xe = jnp.pad(x, ((0, 0), (1, 1), (0, 0), (0, 0)), mode="edge")
    in_specs = [
        pl.BlockSpec((1, 1, W, C), lambda b, i, dh=dh: (b, i + dh, 0, 0))
        for dh in range(3)
    ]
    out = pl.pallas_call(
        _upsample2x_kernel,
        out_shape=jax.ShapeDtypeStruct((B, 2 * H, W, 2 * C), x.dtype),
        grid_spec=pltpu.PrefetchScalarGridSpec(
            num_scalar_prefetch=0,
            grid=(B, H),
            in_specs=in_specs,
            out_specs=pl.BlockSpec((1, 2, W, 2 * C), lambda b, i: (b, i, 0, 0)),
        ),
        compiler_params=pltpu.CompilerParams(
            dimension_semantics=("parallel", "parallel")
        ),
    )(xe, xe, xe)
    # (even|odd)-on-lanes -> interleaved columns: both reshapes are contiguous
    # split/merge, i.e. layout-only (free) in XLA.
    return out.reshape(B, 2 * H, W, 2, C).reshape(B, 2 * H, 2 * W, C)


def conv1x1_lane_padded(x, w_pad, b_pad, num_classes):
    """1x1 conv whose Cout is padded to a multiple of 128 (lane-dense stores)."""
    B, H, W, C = x.shape
    y = pallas_matmul_bias(x.reshape(B * H * W, C), w_pad, b_pad,
                           relu=False, out_dtype=jnp.float32)
    return y[:, :num_classes].reshape(B, H, W, num_classes)


# ----------------------------------------------------------------------------
# Model: encoder (stand-in) + SAMSegmentationDecoder
# ----------------------------------------------------------------------------
class SAMSegmentationModelPallas:
    # TODO(synk): the real SAM image encoder is an external pretrained nn.Module
    # passed into __init__; it is replaced by a deterministic patch-embedding
    # stand-in (k=4, s=4, 3 -> 1280) producing the [B, 1280, H/4, W/4] features
    # the decoder expects.
    def __init__(self, num_classes=19, encoder_out_dim=1280, patch=4, seed=0):
        self.patch = patch
        self.num_classes = num_classes
        key = jax.random.PRNGKey(seed)
        ks = jax.random.split(key, 8)

        def init_w(k, shape, fan_in, dtype=jnp.bfloat16):
            w = jax.random.normal(k, shape, jnp.float32) / np.sqrt(fan_in)
            return w.astype(dtype)

        # encoder stand-in: [patch*patch*3, encoder_out_dim]
        fe = patch * patch * 3
        self.enc_w = init_w(ks[0], (fe, encoder_out_dim), fe)
        self.enc_b = jnp.zeros((encoder_out_dim,), jnp.float32)

        # decoder (weights stored once in bf16, [kh, kw, Cin, Cout] layout):
        #   Conv2d(1280,512,3,p=1) -> ReLU -> Up2x
        #   Conv2d(512,256,3,p=1)  -> ReLU -> Up2x
        #   Conv2d(256,num_classes,1)
        self.w1 = init_w(ks[1], (3, 3, encoder_out_dim, 512), encoder_out_dim * 9)
        self.b1 = init_w(ks[2], (512,), encoder_out_dim * 9, jnp.float32)
        self.w2 = init_w(ks[3], (3, 3, 512, 256), 512 * 9)
        self.b2 = init_w(ks[4], (256,), 512 * 9, jnp.float32)

        n_pad = ((num_classes + 127) // 128) * 128   # lane-dense head
        w3 = init_w(ks[5], (256, num_classes), 256)
        b3 = init_w(ks[6], (num_classes,), 256, jnp.float32)
        self.w3 = jnp.zeros((256, n_pad), jnp.bfloat16).at[:, :num_classes].set(w3)
        self.b3 = jnp.zeros((n_pad,), jnp.float32).at[:num_classes].set(b3)

    def _encoder(self, x_nhwc):
        B, H, W, C = x_nhwc.shape
        p = self.patch
        ph, pw = H // p, W // p
        patches = (x_nhwc.reshape(B, ph, p, pw, p, C)
                   .transpose(0, 1, 3, 2, 4, 5)
                   .reshape(B * ph * pw, p * p * C)
                   .astype(jnp.bfloat16))
        feats = pallas_matmul_bias(patches, self.enc_w, self.enc_b,
                                   relu=False, out_dtype=jnp.bfloat16)
        return feats.reshape(B, ph, pw, -1)

    def __call__(self, x_nchw):
        x = jnp.transpose(x_nchw, (0, 2, 3, 1)).astype(jnp.float32)    # NHWC
        # mirrors `with torch.no_grad(): feats = self.encoder(x)`
        feats = jax.lax.stop_gradient(self._encoder(x))
        h = conv3x3_same(feats, self.w1, self.b1, relu=True)
        h = upsample2x_bilinear(h)
        h = conv3x3_same(h, self.w2, self.b2, relu=True)
        h = upsample2x_bilinear(h)
        logits = conv1x1_lane_padded(h, self.w3, self.b3, self.num_classes)
        return jnp.transpose(logits, (0, 3, 1, 2))                     # NCHW


if __name__ == "__main__":
    key = jax.random.PRNGKey(0)
    # 32x32 image; patch-embed stand-in downsamples 4x -> 1280-ch 8x8 feature
    # map, decoder upsamples 4x back -> [B, 19, 32, 32]
    x = jax.random.normal(key, (2, 3, 32, 32), jnp.float32)

    model = SAMSegmentationModelPallas(num_classes=19, encoder_out_dim=1280)
    out = jax.block_until_ready(model(x))

    assert out.shape == (2, 19, 32, 32), out.shape
    assert out.dtype == jnp.float32
    assert bool(jnp.all(jnp.isfinite(out)))
    print("KERNEL_OK")
</pallas_src>

<mosaic_0001>
module attributes {stable_mosaic.version = 11 : i64} {
  func.func @_matmul_bias_kernel(%arg0: i32, %arg1: i32, %arg2: i32, %arg3: memref<128x48xbf16, #tpu.memory_space<vmem>>, %arg4: memref<48x256xbf16, #tpu.memory_space<vmem>>, %arg5: memref<1x256xf32, #tpu.memory_space<vmem>>, %arg6: memref<128x256xbf16, #tpu.memory_space<vmem>>, %arg7: memref<128x256xf32, #tpu.memory_space<vmem>>) attributes {dimension_semantics = [#tpu.dimension_semantics<parallel>, #tpu.dimension_semantics<parallel>, #tpu.dimension_semantics<arbitrary>], iteration_bounds = array<i64: 1, 5, 1>, scalar_prefetch = 0 : i64, scratch_operands = 1 : i64, tpu.core_type = #tpu.core_type<tc>, window_params = [{transform_indices = @transform_0, window_bounds = array<i64: 128, 48>}, {transform_indices = @transform_1, window_bounds = array<i64: 48, 256>}, {transform_indices = @transform_2, window_bounds = array<i64: 1, 256>}, {transform_indices = @transform_3, window_bounds = array<i64: 128, 256>}]} {
    %c0_i32 = arith.constant 0 : i32
    %0 = arith.cmpi eq, %arg2, %c0_i32 : i32
    %1 = arith.extui %0 : i1 to i32
    %c0_i32_0 = arith.constant 0 : i32
    %2 = arith.cmpi ne, %1, %c0_i32_0 : i32
    scf.if %2 {
      %cst_10 = arith.constant 0.000000e+00 : f32
      %12 = vector.broadcast %cst_10 : f32 to vector<128x256xf32>
      %c0_11 = arith.constant 0 : index
      %c0_12 = arith.constant 0 : index
      %13 = vector.load %arg7[%c0_11, %c0_12] : memref<128x256xf32, #tpu.memory_space<vmem>>, vector<128x256xf32>
      tpu.vector_store %arg7[%c0_11, %c0_12], %12 {strides = array<i32>} : memref<128x256xf32, #tpu.memory_space<vmem>>, vector<128x256xf32>,
    } else {
    }
    %c0 = arith.constant 0 : index
    %c0_1 = arith.constant 0 : index
    %3 = vector.load %arg7[%c0, %c0_1] : memref<128x256xf32, #tpu.memory_space<vmem>>, vector<128x256xf32>
    %c0_2 = arith.constant 0 : index
    %c0_3 = arith.constant 0 : index
    %4 = vector.load %arg3[%c0_2, %c0_3] : memref<128x48xbf16, #tpu.memory_space<vmem>>, vector<128x48xbf16>
    %c0_4 = arith.constant 0 : index
    %c0_5 = arith.constant 0 : index
    %5 = vector.load %arg4[%c0_4, %c0_5] : memref<48x256xbf16, #tpu.memory_space<vmem>>, vector<48x256xbf16>
    %cst = arith.constant dense<0.000000e+00> : vector<128x256xf32>
    %6 = tpu.matmul %4, %5, %cst {dimension_numbers = #tpu.dot_dimension_numbers<[1], [0], [0], [1], [0, 0, 1, 1], [], []>} : vector<128x48xbf16>, vector<48x256xbf16>, vector<128x256xf32> -> vector<128x256xf32>
    %7 = arith.addf %3, %6 : vector<128x256xf32>
    %c0_6 = arith.constant 0 : index
    %c0_7 = arith.constant 0 : index
    %8 = vector.load %arg7[%c0_6, %c0_7] : memref<128x256xf32, #tpu.memory_space<vmem>>, vector<128x256xf32>
    tpu.vector_store %arg7[%c0_6, %c0_7], %7 {strides = array<i32>} : memref<128x256xf32, #tpu.memory_space<vmem>>, vector<128x256xf32>,
    %c0_i32_8 = arith.constant 0 : i32
    %9 = arith.cmpi eq, %arg2, %c0_i32_8 : i32
    %10 = arith.extui %9 : i1 to i32
    %c0_i32_9 = arith.constant 0 : i32
    %11 = arith.cmpi ne, %10, %c0_i32_9 : i32
    scf.if %11 {
      %c0_10 = arith.constant 0 : index
      %c0_11 = arith.constant 0 : index
      %12 = vector.load %arg7[%c0_10, %c0_11] : memref<128x256xf32, #tpu.memory_space<vmem>>, vector<128x256xf32>
      %c0_12 = arith.constant 0 : index
      %c0_13 = arith.constant 0 : index
      %13 = vector.load %arg5[%c0_12, %c0_13] : memref<1x256xf32, #tpu.memory_space<vmem>>, vector<1x256xf32>
      %14 = vector.broadcast %13 : vector<1x256xf32> to vector<128x256xf32>
      %15 = arith.addf %12, %14 : vector<128x256xf32>
      %16 = arith.truncf %15 : vector<128x256xf32> to vector<128x256xbf16>
      %c0_14 = arith.constant 0 : index
      %c0_15 = arith.constant 0 : index
      %17 = vector.load %arg6[%c0_14, %c0_15] : memref<128x256xbf16, #tpu.memory_space<vmem>>, vector<128x256xbf16>
      tpu.vector_store %arg6[%c0_14, %c0_15], %16 {strides = array<i32>} : memref<128x256xbf16, #tpu.memory_space<vmem>>, vector<128x256xbf16>,
    } else {
    }
    return
  }
  func.func @transform_0(%arg0: i32, %arg1: i32, %arg2: i32) -> (i32, i32) {
    %c0_i32 = arith.constant 0 : i32
    return %arg0, %arg2 : i32, i32
  }
  func.func @transform_1(%arg0: i32, %arg1: i32, %arg2: i32) -> (i32, i32) {
    %c0_i32 = arith.constant 0 : i32
    return %arg2, %arg1 : i32, i32
  }
  func.func @transform_2(%arg0: i32, %arg1: i32, %arg2: i32) -> (i32, i32) {
    %c0_i32 = arith.constant 0 : i32
    %c0_i32_0 = arith.constant 0 : i32
    return %c0_i32, %arg1 : i32, i32
  }
  func.func @transform_3(%arg0: i32, %arg1: i32, %arg2: i32) -> (i32, i32) {
    %c0_i32 = arith.constant 0 : i32
    return %arg0, %arg1 : i32, i32
  }
}

</mosaic_0001>

<bundles_post_ra>
// kernel: tpu_custom_call.1
= control target key start
LH: loop header
LB: loop body
LE: loop exit
PB: predicated region body
PF: predicated region fallthrough
CT: control target
= control target key end

     0   :  { %8 = vsyncpa [#allocation4], 0  ;;  %s1399_s0 = inlined_call_operand.vmem [shape: bf16[128,48], index: 0, kind: input, shape index: {}]   ;;  %s1400_s1 = inlined_call_operand.hbm [shape: bf16[48,1280], index: 1, kind: input, shape index: {}]   ;;  %s1401_s2 = inlined_call_operand.vmem [shape: f32[1,1280], index: 2, kind: input, shape index: {}]   ;;  %s1402_s3 = inlined_call_operand.hbm [shape: bf16[128,1280], index: 3, kind: output, shape index: {}]  }
   0x1   :  { %10 = vsyncpa [#allocation4 + $0x1], 0 }
   0x2   :  { %11 = vsyncpa [#allocation5], 0 }
   0x3   :  { %13 = vsyncpa [#allocation5 + $0x1], 0  ;;  %s1181_s12 = smov 0   ;;  %s1183_s13 = smov 0  }
   0x4   :  { %s1185_s14 = smov 0   ;;  %s1187_s15 = smov 0  }
   0x5   :  { %s1189_s16 = smov 0   ;;  %s1191_s17 = smov 0  }
   0x6 LB: > { %s862_s18 = sadd.s32 4294967295, %s1153_s17   ;;  %s863_s19 = sadd.s32 4294967294, %s1153_s17   ;;  %s1153_s17 = sphi %s1191_s17, %s19_s17   ;;  %s1149_s16 = sphi %s1189_s16, %s1411_s16   ;;  %s1145_s15 = sphi %s1187_s15, %s1410_s15   ;;  %s1141_s14 = sphi %s1185_s14, %s1409_s14   ;;  %s1137_s13 = sphi %s1183_s13, %s1408_s13   ;;  %s1133_s12 = sphi %s1181_s12, %s1407_s12  }
   0x7   : > { %s34_s20 = sadd.s32 1, %s1149_s16  ;;  %s75_s21 = sadd.s32 1, %s1141_s14 }
   0x8   : > { %p36_p0 = scmp.ge.s32.totalorder %s34_s20, 5  ;;  %p82_p1 = scmp.ne.s32.totalorder %s1141_s14, %s1137_s13 }
   0x9   : > { %p83_p2 = scmp.eq.s32.totalorder %s1153_s17, 0  ;;  %p88_p3 = scmp.ne.s32.totalorder %s1137_s13, %s1133_s12 }
   0xa   : > { %s1413_s20 = smov (%p36_p0, %s34_s20), 0  ;;  %p89_p5 = scmp.eq.s32.totalorder %s862_s18, 0 }
   0xb   : > { %p1222_p4 = por %p83_p2, %p82_p1  ;;  %s71_s23 = ssub.s32 %s1149_s16, %s1413_s20 }
   0xc   : > { %p140_p6 = scmp.eq.s32.totalorder %s862_s18, 4  ;;  %p73_p7 = scmp.eq.s32.totalorder %s71_s23, 0 }
   0xd   : > { %p1228_p8 = por %p89_p5, %p88_p3  ;;  %p146_p10 = scmp.eq.s32.totalorder %s863_s19, 4 }
   0xe   : > { %p1232_p9 = por %p140_p6, %p82_p1  ;;  %p985_p12 = scmp.lt.s32.totalorder %s1153_s17, 5 }
   0xf   : > { %s1237_s26 = scalar_select %p73_p7, %s1141_s14, %s75_s21  }
  0x10   : > { %p1239_p11 = por %p146_p10, %p88_p3  ;;  %s178_s28 = sand.u32 1, %s1141_s14  }
  0x11   : > { %s971_s29 = smul.u32 48, %s178_s28  ;;  %s949_s30 = sshll.u32 %s1149_s16, 3 }
  0x12   : > { %p978_p13 = pnand %p985_p12, %p1222_p4  ;;  %s190_s6 = scalar_lea.hbm %s1400_s1, %s949_s30 }
  0x13   : > { %s191_s7 = sshll.u32 %s190_s6, 4  ;;  %s182_s8 = scalar_lea.vmem [#allocation3], %s971_s29  ;;  %s192_s7 = int_to_ptr.hbm [resolvable:$true] %s191_s7 }
  0x14   : > { %s193_s9 = sshll.u32 %s182_s8, 4  ;;  %s179_s10 = scalar_lea.sflag [#allocation4], %s178_s28  ;;  %s194_s9 = int_to_ptr.vmem [resolvable:$true] %s193_s9 }
  0x15   : > { %s1155_s11 = smov 640   ;;  %s1156_s18 = smov 128  }
  0x16   : > { %s1157_s19 = smov 8   ;;  %p869_p0 = scmp.ge.s32.totalorder %s1153_s17, 1 }
  0x17   : > { %980 = dma.hbm_to_vmem [thread:$0]  (!%p978_p13), %s192_s7, 768, %s194_s9, %s179_s10, %s1155_s11, %s1156_s18, %s1157_s19  }
  0x18   : > { %p209_p1 = scmp.lt.s32.totalorder %s1153_s17, 6 }
  0x1a   : > { %p210_p2 = pnand %p869_p0, %p209_p1 }
  0x1b   : > { %s1254_s21 = sand.u32 (!%p210_p2), 1, %s1137_s13  }
  0x1c   : > { %213 = sbr.rel (%p210_p2) target bundleno = 246 (0xf6), region = 32  ;;  %s216_s23 = scalar_lea.sflag (!%p210_p2), [#allocation4], %s1254_s21 }
  0x1d   : > { %s972_s22 = smul.u32 (!%p210_p2), 48, %s1254_s21 }
  0x1f   : > { %s219_s29 = scalar_lea.vmem (!%p210_p2), [#allocation3], %s972_s22 }
  0x21   : > { %1124 = dma.done.wait (%p1228_p8), %s216_s23, 768  }
  0x22   : > { %1126 = vsyncadd (%p1228_p8), %s216_s23, 4294966528  ;;  %v922_v0 = vld [vmem:[%s219_s29 + $0x20] sm:$0xf]  ;;  %v963_v1 = vld [vmem:[%s219_s29 + $0x24] sm:$0xf0]  ;;  %vm434_vm0 = vcmask 392192  }
  0x23   : > { %v962_v2 = vld [vmem:[%s219_s29 + $0x24] sm:$0xf]  ;;  %v923_v3 = vor.u32 %v963_v1, %v922_v0  ;;  %v924_v4 = vld [vmem:[%s219_s29 + $0x28] sm:$0xf0]  ;;  %v914_v5 = vld [vmem:[%s219_s29 + $0x10] sm:$0xf] }
  0x24   : > { %v961_v6 = vld [vmem:[%s219_s29 + $0x14] sm:$0xf0]  ;;  %v927_v7 = vor.u32 %v962_v2, %v924_v4  ;;  %v960_v8 = vld [vmem:[%s219_s29 + $0x14] sm:$0xf]  ;;  %v916_v9 = vld [vmem:[%s219_s29 + $0x18] sm:$0xf0] }
  0x25   : > { %464 = vmatpush.bf16.msra.mxu0 %v923_v3  ;;  %965 = vmatpush.bf16.msra.mxu2 %v923_v3  ;;  %v915_v10 = vor.u32 %v961_v6, %v914_v5  ;;  %v919_v11 = vor.u32 %v960_v8, %v916_v9  ;;  %v906_v12 = vld [vmem:[%s219_s29] sm:$0xf]  ;;  %v959_v13 = vld [vmem:[%s219_s29 + $0x4] sm:$0xf0]  ;;  %v958_v14 = vld [vmem:[%s219_s29 + $0x4] sm:$0xf] }
  0x26   : > { %513 = vmatpush.bf16.msra.mxu1 %v927_v7  ;;  %968 = vmatpush.bf16.msra.mxu3 %v927_v7  ;;  %v908_v15 = vld [vmem:[%s219_s29 + $0x8] sm:$0xf0]  ;;  %v907_v16 = vor.u32 %v959_v13, %v906_v12  ;;  %v950_v18 = vld [vmem:[%s1399_s0] sm:$0xff]  ;;  %v952_v22 = vld [vmem:[%s1399_s0 + $0x10] sm:$0xff]  ;;  %s871_s24 = sshll.u32 %s1145_s15, 1  ;;  %s870_s5 = sshll.u32 %s1254_s21, 7 }
  0x27   : > { %v911_v17 = vor.u32 %v958_v14, %v908_v15  ;;  %v954_v19 = vld [vmem:[%s1399_s0 + $0x20] sm:$0xff]  ;;  %v951_v20 = vld [vmem:[%s1399_s0 + $0x8] sm:$0xff]  ;;  %v956_v23 = vld [vmem:[%s1399_s0 + $0x30] sm:$0xff]  ;;  %p267_p3 = scmp.lt.s32.totalorder %s871_s24, 9  ;;  %s1313_s6 = scalar_lea.vmem [#allocation6], %s870_s5 }
  0x28   : > { %v955_v21 = vld [vmem:[%s1399_s0 + $0x28] sm:$0xff]  ;;  %v953_v24 = vld [vmem:[%s1399_s0 + $0x18] sm:$0xff]  ;;  %s964_s7 = sshll.u32 %s1145_s15, 3  ;;  %s742_s11 = sshll.u32 %s1313_s6, 4  ;;  %s743_s11 = int_to_ptr.vmem [resolvable:$true] %s742_s11 }
  0x29   : > { %465 = vmatpush.bf16.msra.mxu0 %v915_v10  ;;  %966 = vmatpush.bf16.msra.mxu2 %v915_v10  ;;  %v957_v25 = vld [vmem:[%s1399_s0 + $0x38] sm:$0xff]  ;;  %s1415_s24 = smov (!%p267_p3, %s871_s24), 9  ;;  %s741_s10 = scalar_lea.hbm %s1402_s3, %s964_s7 }
  0x2a   : > { %514 = vmatpush.bf16.msra.mxu1 %v919_v11  ;;  %969 = vmatpush.bf16.msra.mxu3 %v919_v11  ;;  %s269_s4 = scalar_lea.vmem %s1401_s2, %s1415_s24  ;;  %s744_s18 = sshll.u32 %s741_s10, 4  ;;  %s745_s18 = int_to_ptr.hbm [resolvable:$true] %s744_s18 }
  0x2b   : > { %v656_v26 = vld [vmem:[%s269_s4] sm:$0x3]  ;;  %s727_s15 = scalar_lea.sflag [#allocation5], %s1254_s21  ;;  %s1085_s19 = sshra.s32 %s745_s18, 4  ;;  %s1086_s19 = int_to_ptr.hbm [resolvable:$true] %s1085_s19 }
  0x2c   : > { %v1306_v27 = vperm.slane %v656_v26, 0  ;;  %v1308_v28 = vperm.slane %v656_v26, 1  ;;  %s1087_s22 = scalar_lea.hbm %s1086_s19, 128  ;;  %s1091_s24 = scalar_lea.hbm %s1402_s3, 640 }
  0x2d   : > { %466 = vmatpush.bf16.msra.mxu0 %v907_v16  ;;  %967 = vmatpush.bf16.msra.mxu2 %v907_v16  ;;  %p1088_p4 = scmp.ne.s32.totalorder %s1086_s19, %s1087_s22  ;;  %p1092_p7 = scmp.lt.s32.totalorder %s1086_s19, %s1402_s3 }
  0x2e   : > { %515 = vmatpush.bf16.msra.mxu1 %v911_v17  ;;  %970 = vmatpush.bf16.msra.mxu3 %v911_v17  ;;  %p1093_p8 = scmp.lt.s32.totalorder %s1091_s24, %s1087_s22 }
  0x2f   : > { %p1089_p5 = pnand %p1088_p4, %p1232_p9 }
  0x30   : > { %928 = vmatmul.msk.bf16.vlgmr.msra.gmra.mxu0 %vm434_vm0, %v950_v18  ;;  %932 = vmatmul.msk.bf16.vlgmr.msra.gmra.mxu2 %vm434_vm0, %v954_v19  ;;  %p1094_p10 = por %p1093_p8, %p1092_p7 }
  0x31   : > { %936 = vmatmul.msk.bf16.vlgmr.msra.gmra.mxu1 %vm434_vm0, %v950_v18  ;;  %940 = vmatmul.msk.bf16.vlgmr.msra.gmra.mxu3 %vm434_vm0, %v954_v19  ;;  %p1090_p6 = pneg %p1089_p5 }
  0x33   : > { %p1095_p12 = pnand %p1094_p10, %p1090_p6 }
  0x40   : > { %929 = vmatmul.msk.bf16.gmra.mxu0 %vm434_vm0, %v951_v20  ;;  %933 = vmatmul.msk.bf16.gmra.mxu2 %vm434_vm0, %v955_v21 }
  0x41   : > { %937 = vmatmul.msk.bf16.gmra.mxu1 %vm434_vm0, %v951_v20  ;;  %941 = vmatmul.msk.bf16.gmra.mxu3 %vm434_vm0, %v955_v21 }
  0x50   : > { %930 = vmatmul.msk.bf16.gmra.mxu0 %vm434_vm0, %v952_v22  ;;  %934 = vmatmul.msk.bf16.gmra.mxu2 %vm434_vm0, %v956_v23 }
  0x51   : > { %938 = vmatmul.msk.bf16.gmra.mxu1 %vm434_vm0, %v952_v22  ;;  %942 = vmatmul.msk.bf16.gmra.mxu3 %vm434_vm0, %v956_v23 }
  0x60   : > { %931 = vmatmul.msk.bf16.gmra.mxu0 %vm434_vm0, %v953_v24  ;;  %935 = vmatmul.msk.bf16.gmra.mxu2 %vm434_vm0, %v957_v25 }
  0x61   : > { %939 = vmatmul.msk.bf16.gmra.mxu1 %vm434_vm0, %v953_v24  ;;  %943 = vmatmul.msk.bf16.gmra.mxu3 %vm434_vm0, %v957_v25 }
  0xad   : > { %v468_v29 = vpop.f32.mrf.mxu0 }
  0xae   : > { %v662_v30 = vadd.f32 %v1306_v27, %v468_v29  ;;  %v517_v31 = vpop.f32.mrf.mxu1 }
  0xaf   : > { %v663_v32 = vadd.f32 %v1308_v28, %v517_v31 }
  0xb1   : > { %v694_v33 = vpack.c.bf16 %v663_v32, %v662_v30 }
  0xb3   : > { %710 = vst [vmem:[%s1313_s6] sm:$0xff] %v694_v33  ;;  %v488_v34 = vpop.f32.mrf.mxu2 }
  0xb4   : > { %v678_v35 = vadd.f32 %v1306_v27, %v488_v34  ;;  %v537_v36 = vpop.f32.mrf.mxu3 }
  0xb5   : > { %v679_v37 = vadd.f32 %v1308_v28, %v537_v36  ;;  %v470_v38 = vpop.f32.mrf.mxu0 }
  0xb6   : > { %v664_v39 = vadd.f32 %v1306_v27, %v470_v38  ;;  %v519_v40 = vpop.f32.mrf.mxu1 }
  0xb7   : > { %v702_v41 = vpack.c.bf16 %v679_v37, %v678_v35  ;;  %v665_v42 = vadd.f32 %v1308_v28, %v519_v40 }
  0xb9   : > { %718 = vst [vmem:[%s1313_s6 + $0x40] sm:$0xff] %v702_v41  ;;  %v695_v43 = vpack.c.bf16 %v665_v42, %v664_v39 }
  0xbb   : > { %711 = vst [vmem:[%s1313_s6 + $0x8] sm:$0xff] %v695_v43  ;;  %v490_v44 = vpop.f32.mrf.mxu2 }
  0xbc   : > { %v680_v45 = vadd.f32 %v1306_v27, %v490_v44  ;;  %v539_v46 = vpop.f32.mrf.mxu3 }
  0xbd   : > { %v681_v47 = vadd.f32 %v1308_v28, %v539_v46  ;;  %v473_v48 = vpop.f32.mrf.mxu0 }
  0xbe   : > { %v666_v49 = vadd.f32 %v1306_v27, %v473_v48  ;;  %v522_v50 = vpop.f32.mrf.mxu1 }
  0xbf   : > { %v703_v51 = vpack.c.bf16 %v681_v47, %v680_v45  ;;  %v667_v52 = vadd.f32 %v1308_v28, %v522_v50 }
  0xc1   : > { %719 = vst [vmem:[%s1313_s6 + $0x48] sm:$0xff] %v703_v51  ;;  %v696_v53 = vpack.c.bf16 %v667_v52, %v666_v49 }
  0xc3   : > { %712 = vst [vmem:[%s1313_s6 + $0x10] sm:$0xff] %v696_v53  ;;  %v493_v54 = vpop.f32.mrf.mxu2 }
  0xc4   : > { %v682_v55 = vadd.f32 %v1306_v27, %v493_v54  ;;  %v542_v56 = vpop.f32.mrf.mxu3 }
  0xc5   : > { %v683_v57 = vadd.f32 %v1308_v28, %v542_v56  ;;  %v475_v58 = vpop.f32.mrf.mxu0 }
  0xc6   : > { %v668_v59 = vadd.f32 %v1306_v27, %v475_v58  ;;  %v524_v60 = vpop.f32.mrf.mxu1 }
  0xc7   : > { %v704_v61 = vpack.c.bf16 %v683_v57, %v682_v55  ;;  %v669_v62 = vadd.f32 %v1308_v28, %v524_v60 }
  0xc9   : > { %720 = vst [vmem:[%s1313_s6 + $0x50] sm:$0xff] %v704_v61  ;;  %v697_v63 = vpack.c.bf16 %v669_v62, %v668_v59 }
  0xcb   : > { %713 = vst [vmem:[%s1313_s6 + $0x18] sm:$0xff] %v697_v63  ;;  %v495_v0 = vpop.f32.mrf.mxu2 }
  0xcc   : > { %v684_v1 = vadd.f32 %v1306_v27, %v495_v0  ;;  %v544_v2 = vpop.f32.mrf.mxu3 }
  0xcd   : > { %v685_v3 = vadd.f32 %v1308_v28, %v544_v2  ;;  %v478_v4 = vpop.f32.mrf.mxu0 }
  0xce   : > { %v670_v5 = vadd.f32 %v1306_v27, %v478_v4  ;;  %v527_v6 = vpop.f32.mrf.mxu1 }
  0xcf   : > { %v705_v7 = vpack.c.bf16 %v685_v3, %v684_v1  ;;  %v671_v8 = vadd.f32 %v1308_v28, %v527_v6 }
  0xd1   : > { %721 = vst [vmem:[%s1313_s6 + $0x58] sm:$0xff] %v705_v7  ;;  %v698_v9 = vpack.c.bf16 %v671_v8, %v670_v5 }
  0xd3   : > { %714 = vst [vmem:[%s1313_s6 + $0x20] sm:$0xff] %v698_v9  ;;  %v498_v10 = vpop.f32.mrf.mxu2 }
  0xd4   : > { %v686_v11 = vadd.f32 %v1306_v27, %v498_v10  ;;  %v547_v12 = vpop.f32.mrf.mxu3 }
  0xd5   : > { %v687_v13 = vadd.f32 %v1308_v28, %v547_v12  ;;  %v480_v14 = vpop.f32.mrf.mxu0 }
  0xd6   : > { %v672_v15 = vadd.f32 %v1306_v27, %v480_v14  ;;  %v529_v16 = vpop.f32.mrf.mxu1 }
  0xd7   : > { %v706_v17 = vpack.c.bf16 %v687_v13, %v686_v11  ;;  %v673_v18 = vadd.f32 %v1308_v28, %v529_v16 }
  0xd9   : > { %722 = vst [vmem:[%s1313_s6 + $0x60] sm:$0xff] %v706_v17  ;;  %v699_v19 = vpack.c.bf16 %v673_v18, %v672_v15 }
  0xdb   : > { %715 = vst [vmem:[%s1313_s6 + $0x28] sm:$0xff] %v699_v19  ;;  %v500_v20 = vpop.f32.mrf.mxu2 }
  0xdc   : > { %v688_v21 = vadd.f32 %v1306_v27, %v500_v20  ;;  %v549_v22 = vpop.f32.mrf.mxu3 }
  0xdd   : > { %v689_v23 = vadd.f32 %v1308_v28, %v549_v22  ;;  %v483_v24 = vpop.f32.mrf.mxu0 }
  0xde   : > { %v674_v25 = vadd.f32 %v1306_v27, %v483_v24  ;;  %v532_v26 = vpop.f32.mrf.mxu1 }
  0xdf   : > { %v707_v29 = vpack.c.bf16 %v689_v23, %v688_v21  ;;  %v675_v30 = vadd.f32 %v1308_v28, %v532_v26 }
  0xe1   : > { %723 = vst [vmem:[%s1313_s6 + $0x68] sm:$0xff] %v707_v29  ;;  %v700_v31 = vpack.c.bf16 %v675_v30, %v674_v25 }
  0xe3   : > { %716 = vst [vmem:[%s1313_s6 + $0x30] sm:$0xff] %v700_v31  ;;  %v503_v32 = vpop.f32.mrf.mxu2 }
  0xe4   : > { %v690_v33 = vadd.f32 %v1306_v27, %v503_v32  ;;  %v552_v34 = vpop.f32.mrf.mxu3 }
  0xe5   : > { %v691_v35 = vadd.f32 %v1308_v28, %v552_v34  ;;  %v485_v36 = vpop.f32.mrf.mxu0 }
  0xe6   : > { %v676_v37 = vadd.f32 %v1306_v27, %v485_v36  ;;  %v534_v38 = vpop.f32.mrf.mxu1 }
  0xe7   : > { %v708_v39 = vpack.c.bf16 %v691_v35, %v690_v33  ;;  %v677_v40 = vadd.f32 %v1308_v28, %v534_v38 }
  0xe9   : > { %724 = vst [vmem:[%s1313_s6 + $0x70] sm:$0xff] %v708_v39  ;;  %v701_v41 = vpack.c.bf16 %v677_v40, %v676_v37 }
  0xeb   : > { %717 = vst [vmem:[%s1313_s6 + $0x38] sm:$0xff] %v701_v41  ;;  %v505_v42 = vpop.f32.mrf.mxu2 }
  0xec   : > { %v692_v43 = vadd.f32 %v1306_v27, %v505_v42  ;;  %v554_v44 = vpop.f32.mrf.mxu3 }
  0xed   : > { %v693_v45 = vadd.f32 %v1308_v28, %v554_v44 }
  0xef   : > { %v709_v46 = vpack.c.bf16 %v693_v45, %v692_v43 }
  0xf1   : > { %725 = vst [vmem:[%s1313_s6 + $0x78] sm:$0xff] %v709_v46 }
  0xf2   : > { %1098 = shalt.err (!%p1095_p12)
}
  0xf3   : > { %s1158_s21 = smov 128   ;;  %s1159_s4 = smov 640  }
  0xf4   : > { %s1160_s5 = smov 8  }
  0xf5   : > { %975 = dma.vmem_to_hbm [thread:$0]  (%p1232_p9), %s743_s11, 2048, %s745_s18, %s727_s15, %s1158_s21, %s1159_s4, %s1160_s5  }
  0xf6 PF: > { %p986_p13 = scmp.ge.s32.totalorder %s1153_s17, 2  ;;  %s759_s6 = sand.u32 1, %s1133_s12  }
  0xf7   : > { %s760_s7 = scalar_lea.sflag [#allocation5], %s759_s6 }
  0xf8   : > { %p982_p0 = pnand %p986_p13, %p1239_p11 }
  0xfa   : > { %p983_p1 = pneg %p982_p0 }
  0xfc   : > { %1128 = dma.done.wait (%p983_p1), %s760_s7, 2048  }
  0xfd   : > { %1130 = vsyncadd (%p983_p1), %s760_s7, 4294965248  ;;  %s19_s17 = sadd.s32 1, %s1153_s17   ;;  %s1407_s12 = smov %s1137_s13 }
  0xfe   : > { %p16_p2 = scmp.ge.s32.totalorder %s19_s17, 7   ;;  %s1408_s13 = smov %s1141_s14 }
  0xff   : > { %s1409_s14 = smov %s1237_s26  ;;  %s1410_s15 = smov %s1149_s16 }
 0x100   : > { %s1411_s16 = smov %s1413_s20  ;;  %18 = sbr.rel (!%p16_p2) target bundleno = 6 (0x6), region = 91 }
 0x105   :  { %766 = vsyncpa [#allocation4], 1 }
 0x106   :  { %768 = vsyncpa [#allocation4 + $0x1], 1 }
 0x107   :  { %769 = vsyncpa [#allocation5], 1 }
 0x108   :  { %771 = vsyncpa [#allocation5 + $0x1], 1 }

</bundles_post_ra>
